<compile_context>
chip_gen: v7x
topology: tpu7x:2x2x1
jax: 0.10.0
libtpu: 0.0.40
codegen_flags: <defaults>
</compile_context>

<pallas_src>
import functools

import jax
import jax.numpy as jnp
from jax.experimental import pallas as pl
from jax.experimental.pallas import tpu as pltpu


def _conv_bn_act_kernel(x_ref, w_ref, shift_ref, out_ref, *, row_stride, num_pos):
    """Fused 3x3 conv + BN-shift + hardtanh for a block of TB samples.

    x_ref    : (TB, Cin, Lp)     bf16, zero-padded flattened padded images
    w_ref    : (9, Cout, Cin)    bf16, BN scale folded in (tap order kh*3+kw)
    shift_ref: (Cout, 1)         f32, BN shift (beta - mean*scale)
    out_ref  : (TB, Cout, P)     f32, P = H * (W+2) stride-1 positions
    """
    tb = x_ref.shape[0]
    shift = shift_ref[...]                                # (Cout, 1)
    for b in range(tb):
        acc = None
        for t in range(9):
            kh, kw = divmod(t, 3)
            d = kh * row_stride + kw
            xk = x_ref[b, :, d:d + num_pos]               # (Cin, P) bf16
            part = jnp.dot(w_ref[t], xk,                  # (Cout, Cin)@(Cin, P)
                           preferred_element_type=jnp.float32)
            acc = part if acc is None else acc + part
        y = acc + shift
        out_ref[b] = jnp.clip(y, -1.0, 1.0).astype(out_ref.dtype)


def first_conv_forward(x_nchw, conv_w, gamma, beta, running_mean, running_var,
                       *, stride=1, eps=1e-5, samples_per_step=None):
    """Forward pass of `first_conv` (NCHW in, NCHW out)."""
    N, Cin, H, W = x_nchw.shape
    Cout = conv_w.shape[0]
    Hp, Wp = H + 2, W + 2          # zero-padded spatial dims (pad=1)
    L = Hp * Wp                    # flattened padded image length
    P = H * Wp                     # stride-1 output positions per sample
    #   (2 garbage columns per row, sliced off in the wrapper)

    # ---- fold BN (inference) into the weight / a per-channel shift ----
    inv = gamma / jnp.sqrt(running_var + eps)                         # (Cout,)
    w_folded = conv_w.astype(jnp.float32) * inv[:, None, None, None]  # scale -> W
    shift = (beta - running_mean * inv).astype(jnp.float32).reshape(Cout, 1)
    # (Cout, Cin, 3, 3) -> (kh, kw, Cout, Cin) -> (9, Cout, Cin), bf16 MXU operand
    w9 = jnp.transpose(w_folded, (2, 3, 0, 1)).reshape(9, Cout, Cin)
    w9 = w9.astype(jnp.bfloat16)

    # ---- batch blocking: keep the grid wide enough for v7x's 2 TCs ----
    if samples_per_step is None:
        tb = max(1, min(8, N // 4))
    else:
        tb = samples_per_step
    n_pad = pl.cdiv(N, tb) * tb

    # ---- input prep: bf16, spatial zero-pad, flatten spatial, pad flat dim ----
    xb = x_nchw.astype(jnp.bfloat16)
    xb = jnp.pad(xb, ((0, n_pad - N), (0, 0), (1, 1), (1, 1)))   # (n_pad,Cin,Hp,Wp)
    xb = xb.reshape(n_pad, Cin, L)
    Lp = ((L + 2 + 127) // 128) * 128      # room for the max tap offset (+2)
    xb = jnp.pad(xb, ((0, 0), (0, 0), (0, Lp - L)))

    grid = (n_pad // tb,)
    kernel = functools.partial(_conv_bn_act_kernel, row_stride=Wp, num_pos=P)
    out_raw = pl.pallas_call(
        kernel,
        out_shape=jax.ShapeDtypeStruct((n_pad, Cout, P), jnp.float32),
        grid_spec=pltpu.PrefetchScalarGridSpec(
            num_scalar_prefetch=0,
            grid=grid,
            in_specs=[
                pl.BlockSpec((tb, Cin, Lp), lambda g: (g, 0, 0)),
                pl.BlockSpec((9, Cout, Cin), lambda g: (0, 0, 0)),
                pl.BlockSpec((Cout, 1), lambda g: (0, 0)),
            ],
            out_specs=pl.BlockSpec((tb, Cout, P), lambda g: (g, 0, 0)),
        ),
        compiler_params=pltpu.CompilerParams(
            dimension_semantics=("parallel",),
            vmem_limit_bytes=32 * 1024 * 1024),
    )(xb, w9, shift)

    # (n_pad, Cout, P) -> (N, Cout, H, W): cheap reshape + slice, no transpose.
    out = out_raw.reshape(n_pad, Cout, H, Wp)[:N, :, :, :W]
    if stride != 1:
        # stride-s conv == stride-1 conv subsampled (pad=1, k=3)
        out = out[:, :, ::stride, ::stride]
    return out


def _reference(x_nchw, conv_w, gamma, beta, running_mean, running_var,
               *, stride=1, eps=1e-5):
    y = jax.lax.conv_general_dilated(
        x_nchw.astype(jnp.float32), conv_w.astype(jnp.float32),
        window_strides=(stride, stride), padding=((1, 1), (1, 1)),
        dimension_numbers=("NCHW", "OIHW", "NCHW"))
    inv = gamma / jnp.sqrt(running_var + eps)
    y = y * inv[None, :, None, None] + (beta - running_mean * inv)[None, :, None, None]
    return jnp.clip(y, -1.0, 1.0)


if __name__ == "__main__":
    # small, CIFAR-like shapes: batch=2, in_channels=3, out_channels=16, 16x16 spatial
    N, Cin, Cout, H, W = 2, 3, 16, 16, 16
    key = jax.random.PRNGKey(0)
    k_x, k_w, k_g, k_b, k_m, k_v = jax.random.split(key, 6)

    x = jax.random.normal(k_x, (N, Cin, H, W), dtype=jnp.float32)
    conv_w = 0.2 * jax.random.normal(k_w, (Cout, Cin, 3, 3), dtype=jnp.float32)
    gamma = 1.0 + 0.1 * jax.random.normal(k_g, (Cout,), dtype=jnp.float32)
    beta = 0.1 * jax.random.normal(k_b, (Cout,), dtype=jnp.float32)
    running_mean = 0.1 * jax.random.normal(k_m, (Cout,), dtype=jnp.float32)
    running_var = jnp.abs(1.0 + 0.1 * jax.random.normal(k_v, (Cout,), dtype=jnp.float32))

    fwd = jax.jit(functools.partial(first_conv_forward, stride=1))
    out = fwd(x, conv_w, gamma, beta, running_mean, running_var)
    out = jax.block_until_ready(out)

    ref = _reference(x, conv_w, gamma, beta, running_mean, running_var, stride=1)
    assert out.shape == (N, Cout, H, W), out.shape
    # bf16 MXU operands -> loosened tolerance vs f32 reference
    assert jnp.allclose(out, ref, atol=5e-2, rtol=5e-2), float(jnp.max(jnp.abs(out - ref)))

    print("KERNEL_OK")
</pallas_src>

<mosaic_0001>
module attributes {stable_mosaic.version = 11 : i64} {
  func.func @_conv_bn_act_kernel(%arg0: i32, %arg1: memref<1x3x384xbf16, #tpu.memory_space<vmem>>, %arg2: memref<9x16x3xbf16, #tpu.memory_space<vmem>>, %arg3: memref<16x1xf32, #tpu.memory_space<vmem>>, %arg4: memref<1x16x288xf32, #tpu.memory_space<vmem>>) attributes {dimension_semantics = [#tpu.dimension_semantics<parallel>], iteration_bounds = array<i64: 2>, scalar_prefetch = 0 : i64, scratch_operands = 0 : i64, tpu.core_type = #tpu.core_type<tc>, window_params = [{transform_indices = @transform_0, window_bounds = array<i64: 1, 3, 384>}, {pipeline_mode = #tpu.pipeline_mode<synchronous>, transform_indices = @transform_1, window_bounds = array<i64: 9, 16, 3>}, {pipeline_mode = #tpu.pipeline_mode<synchronous>, transform_indices = @transform_2, window_bounds = array<i64: 16, 1>}, {transform_indices = @transform_3, window_bounds = array<i64: 1, 16, 288>}]} {
    %c0 = arith.constant 0 : index
    %c0_0 = arith.constant 0 : index
    %0 = vector.load %arg3[%c0, %c0_0] : memref<16x1xf32, #tpu.memory_space<vmem>>, vector<16x1xf32>
    %c0_1 = arith.constant 0 : index
    %c0_2 = arith.constant 0 : index
    %c0_3 = arith.constant 0 : index
    %1 = vector.load %arg1[%c0_1, %c0_2, %c0_3] : memref<1x3x384xbf16, #tpu.memory_space<vmem>>, vector<1x3x288xbf16>
    %2 = vector.shape_cast %1 : vector<1x3x288xbf16> to vector<3x288xbf16>
    %c0_4 = arith.constant 0 : index
    %c0_5 = arith.constant 0 : index
    %c0_6 = arith.constant 0 : index
    %3 = vector.load %arg2[%c0_4, %c0_5, %c0_6] : memref<9x16x3xbf16, #tpu.memory_space<vmem>>, vector<1x16x3xbf16>
    %4 = vector.shape_cast %3 : vector<1x16x3xbf16> to vector<16x3xbf16>
    %cst = arith.constant dense<0.000000e+00> : vector<16x288xf32>
    %5 = tpu.matmul %4, %2, %cst {dimension_numbers = #tpu.dot_dimension_numbers<[1], [0], [0], [1], [0, 0, 1, 1], [], []>} : vector<16x3xbf16>, vector<3x288xbf16>, vector<16x288xf32> -> vector<16x288xf32>
    %c0_7 = arith.constant 0 : index
    %c0_8 = arith.constant 0 : index
    %c1 = arith.constant 1 : index
    %6 = vector.load %arg1[%c0_7, %c0_8, %c1] : memref<1x3x384xbf16, #tpu.memory_space<vmem>>, vector<1x3x288xbf16>
    %7 = vector.shape_cast %6 : vector<1x3x288xbf16> to vector<3x288xbf16>
    %c1_9 = arith.constant 1 : index
    %c0_10 = arith.constant 0 : index
    %c0_11 = arith.constant 0 : index
    %8 = vector.load %arg2[%c1_9, %c0_10, %c0_11] : memref<9x16x3xbf16, #tpu.memory_space<vmem>>, vector<1x16x3xbf16>
    %9 = vector.shape_cast %8 : vector<1x16x3xbf16> to vector<16x3xbf16>
    %cst_12 = arith.constant dense<0.000000e+00> : vector<16x288xf32>
    %10 = tpu.matmul %9, %7, %cst_12 {dimension_numbers = #tpu.dot_dimension_numbers<[1], [0], [0], [1], [0, 0, 1, 1], [], []>} : vector<16x3xbf16>, vector<3x288xbf16>, vector<16x288xf32> -> vector<16x288xf32>
    %11 = arith.addf %5, %10 : vector<16x288xf32>
    %c0_13 = arith.constant 0 : index
    %c0_14 = arith.constant 0 : index
    %c2 = arith.constant 2 : index
    %12 = vector.load %arg1[%c0_13, %c0_14, %c2] : memref<1x3x384xbf16, #tpu.memory_space<vmem>>, vector<1x3x288xbf16>
    %13 = vector.shape_cast %12 : vector<1x3x288xbf16> to vector<3x288xbf16>
    %c2_15 = arith.constant 2 : index
    %c0_16 = arith.constant 0 : index
    %c0_17 = arith.constant 0 : index
    %14 = vector.load %arg2[%c2_15, %c0_16, %c0_17] : memref<9x16x3xbf16, #tpu.memory_space<vmem>>, vector<1x16x3xbf16>
    %15 = vector.shape_cast %14 : vector<1x16x3xbf16> to vector<16x3xbf16>
    %cst_18 = arith.constant dense<0.000000e+00> : vector<16x288xf32>
    %16 = tpu.matmul %15, %13, %cst_18 {dimension_numbers = #tpu.dot_dimension_numbers<[1], [0], [0], [1], [0, 0, 1, 1], [], []>} : vector<16x3xbf16>, vector<3x288xbf16>, vector<16x288xf32> -> vector<16x288xf32>
    %17 = arith.addf %11, %16 : vector<16x288xf32>
    %c0_19 = arith.constant 0 : index
    %c0_20 = arith.constant 0 : index
    %c18 = arith.constant 18 : index
    %18 = vector.load %arg1[%c0_19, %c0_20, %c18] : memref<1x3x384xbf16, #tpu.memory_space<vmem>>, vector<1x3x288xbf16>
    %19 = vector.shape_cast %18 : vector<1x3x288xbf16> to vector<3x288xbf16>
    %c3 = arith.constant 3 : index
    %c0_21 = arith.constant 0 : index
    %c0_22 = arith.constant 0 : index
    %20 = vector.load %arg2[%c3, %c0_21, %c0_22] : memref<9x16x3xbf16, #tpu.memory_space<vmem>>, vector<1x16x3xbf16>
    %21 = vector.shape_cast %20 : vector<1x16x3xbf16> to vector<16x3xbf16>
    %cst_23 = arith.constant dense<0.000000e+00> : vector<16x288xf32>
    %22 = tpu.matmul %21, %19, %cst_23 {dimension_numbers = #tpu.dot_dimension_numbers<[1], [0], [0], [1], [0, 0, 1, 1], [], []>} : vector<16x3xbf16>, vector<3x288xbf16>, vector<16x288xf32> -> vector<16x288xf32>
    %23 = arith.addf %17, %22 : vector<16x288xf32>
    %c0_24 = arith.constant 0 : index
    %c0_25 = arith.constant 0 : index
    %c19 = arith.constant 19 : index
    %24 = vector.load %arg1[%c0_24, %c0_25, %c19] : memref<1x3x384xbf16, #tpu.memory_space<vmem>>, vector<1x3x288xbf16>
    %25 = vector.shape_cast %24 : vector<1x3x288xbf16> to vector<3x288xbf16>
    %c4 = arith.constant 4 : index
    %c0_26 = arith.constant 0 : index
    %c0_27 = arith.constant 0 : index
    %26 = vector.load %arg2[%c4, %c0_26, %c0_27] : memref<9x16x3xbf16, #tpu.memory_space<vmem>>, vector<1x16x3xbf16>
    %27 = vector.shape_cast %26 : vector<1x16x3xbf16> to vector<16x3xbf16>
    %cst_28 = arith.constant dense<0.000000e+00> : vector<16x288xf32>
    %28 = tpu.matmul %27, %25, %cst_28 {dimension_numbers = #tpu.dot_dimension_numbers<[1], [0], [0], [1], [0, 0, 1, 1], [], []>} : vector<16x3xbf16>, vector<3x288xbf16>, vector<16x288xf32> -> vector<16x288xf32>
    %29 = arith.addf %23, %28 : vector<16x288xf32>
    %c0_29 = arith.constant 0 : index
    %c0_30 = arith.constant 0 : index
    %c20 = arith.constant 20 : index
    %30 = vector.load %arg1[%c0_29, %c0_30, %c20] : memref<1x3x384xbf16, #tpu.memory_space<vmem>>, vector<1x3x288xbf16>
    %31 = vector.shape_cast %30 : vector<1x3x288xbf16> to vector<3x288xbf16>
    %c5 = arith.constant 5 : index
    %c0_31 = arith.constant 0 : index
    %c0_32 = arith.constant 0 : index
    %32 = vector.load %arg2[%c5, %c0_31, %c0_32] : memref<9x16x3xbf16, #tpu.memory_space<vmem>>, vector<1x16x3xbf16>
    %33 = vector.shape_cast %32 : vector<1x16x3xbf16> to vector<16x3xbf16>
    %cst_33 = arith.constant dense<0.000000e+00> : vector<16x288xf32>
    %34 = tpu.matmul %33, %31, %cst_33 {dimension_numbers = #tpu.dot_dimension_numbers<[1], [0], [0], [1], [0, 0, 1, 1], [], []>} : vector<16x3xbf16>, vector<3x288xbf16>, vector<16x288xf32> -> vector<16x288xf32>
    %35 = arith.addf %29, %34 : vector<16x288xf32>
    %c0_34 = arith.constant 0 : index
    %c0_35 = arith.constant 0 : index
    %c36 = arith.constant 36 : index
    %36 = vector.load %arg1[%c0_34, %c0_35, %c36] : memref<1x3x384xbf16, #tpu.memory_space<vmem>>, vector<1x3x288xbf16>
    %37 = vector.shape_cast %36 : vector<1x3x288xbf16> to vector<3x288xbf16>
    %c6 = arith.constant 6 : index
    %c0_36 = arith.constant 0 : index
    %c0_37 = arith.constant 0 : index
    %38 = vector.load %arg2[%c6, %c0_36, %c0_37] : memref<9x16x3xbf16, #tpu.memory_space<vmem>>, vector<1x16x3xbf16>
    %39 = vector.shape_cast %38 : vector<1x16x3xbf16> to vector<16x3xbf16>
    %cst_38 = arith.constant dense<0.000000e+00> : vector<16x288xf32>
    %40 = tpu.matmul %39, %37, %cst_38 {dimension_numbers = #tpu.dot_dimension_numbers<[1], [0], [0], [1], [0, 0, 1, 1], [], []>} : vector<16x3xbf16>, vector<3x288xbf16>, vector<16x288xf32> -> vector<16x288xf32>
    %41 = arith.addf %35, %40 : vector<16x288xf32>
    %c0_39 = arith.constant 0 : index
    %c0_40 = arith.constant 0 : index
    %c37 = arith.constant 37 : index
    %42 = vector.load %arg1[%c0_39, %c0_40, %c37] : memref<1x3x384xbf16, #tpu.memory_space<vmem>>, vector<1x3x288xbf16>
    %43 = vector.shape_cast %42 : vector<1x3x288xbf16> to vector<3x288xbf16>
    %c7 = arith.constant 7 : index
    %c0_41 = arith.constant 0 : index
    %c0_42 = arith.constant 0 : index
    %44 = vector.load %arg2[%c7, %c0_41, %c0_42] : memref<9x16x3xbf16, #tpu.memory_space<vmem>>, vector<1x16x3xbf16>
    %45 = vector.shape_cast %44 : vector<1x16x3xbf16> to vector<16x3xbf16>
    %cst_43 = arith.constant dense<0.000000e+00> : vector<16x288xf32>
    %46 = tpu.matmul %45, %43, %cst_43 {dimension_numbers = #tpu.dot_dimension_numbers<[1], [0], [0], [1], [0, 0, 1, 1], [], []>} : vector<16x3xbf16>, vector<3x288xbf16>, vector<16x288xf32> -> vector<16x288xf32>
    %47 = arith.addf %41, %46 : vector<16x288xf32>
    %c0_44 = arith.constant 0 : index
    %c0_45 = arith.constant 0 : index
    %c38 = arith.constant 38 : index
    %48 = vector.load %arg1[%c0_44, %c0_45, %c38] : memref<1x3x384xbf16, #tpu.memory_space<vmem>>, vector<1x3x288xbf16>
    %49 = vector.shape_cast %48 : vector<1x3x288xbf16> to vector<3x288xbf16>
    %c8 = arith.constant 8 : index
    %c0_46 = arith.constant 0 : index
    %c0_47 = arith.constant 0 : index
    %50 = vector.load %arg2[%c8, %c0_46, %c0_47] : memref<9x16x3xbf16, #tpu.memory_space<vmem>>, vector<1x16x3xbf16>
    %51 = vector.shape_cast %50 : vector<1x16x3xbf16> to vector<16x3xbf16>
    %cst_48 = arith.constant dense<0.000000e+00> : vector<16x288xf32>
    %52 = tpu.matmul %51, %49, %cst_48 {dimension_numbers = #tpu.dot_dimension_numbers<[1], [0], [0], [1], [0, 0, 1, 1], [], []>} : vector<16x3xbf16>, vector<3x288xbf16>, vector<16x288xf32> -> vector<16x288xf32>
    %53 = arith.addf %47, %52 : vector<16x288xf32>
    %54 = vector.broadcast %0 : vector<16x1xf32> to vector<16x288xf32>
    %55 = arith.addf %53, %54 : vector<16x288xf32>
    %cst_49 = arith.constant -1.000000e+00 : f32
    %cst_50 = arith.constant 1.000000e+00 : f32
    %56 = vector.broadcast %cst_49 : f32 to vector<16x288xf32>
    %57 = arith.maximumf %56, %55 : vector<16x288xf32>
    %58 = vector.broadcast %cst_50 : f32 to vector<16x288xf32>
    %59 = arith.minimumf %58, %57 : vector<16x288xf32>
    %c0_51 = arith.constant 0 : index
    %c0_52 = arith.constant 0 : index
    %c0_53 = arith.constant 0 : index
    %60 = vector.load %arg4[%c0_51, %c0_52, %c0_53] : memref<1x16x288xf32, #tpu.memory_space<vmem>>, vector<1x16x288xf32>
    %61 = vector.shape_cast %60 : vector<1x16x288xf32> to vector<16x288xf32>
    %62 = vector.shape_cast %59 : vector<16x288xf32> to vector<1x16x288xf32>
    tpu.vector_store %arg4[%c0_51, %c0_52, %c0_53], %62 {strides = array<i32>} : memref<1x16x288xf32, #tpu.memory_space<vmem>>, vector<1x16x288xf32>,
    return
  }
  func.func @transform_0(%arg0: i32) -> (i32, i32, i32) {
    %c0_i32 = arith.constant 0 : i32
    %c0_i32_0 = arith.constant 0 : i32
    %c0_i32_1 = arith.constant 0 : i32
    return %arg0, %c0_i32, %c0_i32_0 : i32, i32, i32
  }
  func.func @transform_1(%arg0: i32) -> (i32, i32, i32) {
    %c0_i32 = arith.constant 0 : i32
    %c0_i32_0 = arith.constant 0 : i32
    %c0_i32_1 = arith.constant 0 : i32
    %c0_i32_2 = arith.constant 0 : i32
    return %c0_i32, %c0_i32_0, %c0_i32_1 : i32, i32, i32
  }
  func.func @transform_2(%arg0: i32) -> (i32, i32) {
    %c0_i32 = arith.constant 0 : i32
    %c0_i32_0 = arith.constant 0 : i32
    %c0_i32_1 = arith.constant 0 : i32
    return %c0_i32, %c0_i32_0 : i32, i32
  }
  func.func @transform_3(%arg0: i32) -> (i32, i32, i32) {
    %c0_i32 = arith.constant 0 : i32
    %c0_i32_0 = arith.constant 0 : i32
    %c0_i32_1 = arith.constant 0 : i32
    return %arg0, %c0_i32, %c0_i32_0 : i32, i32, i32
  }
}

</mosaic_0001>

<bundles_post_ra>
// kernel: first_conv_forward.1
= control target key start
LH: loop header
LB: loop body
LE: loop exit
PB: predicated region body
PF: predicated region fallthrough
CT: control target
= control target key end

     0   :  { %s1707_s12 = smov 0   ;;  %s1898_s0 = inlined_call_operand.vmem [shape: bf16[2,3,384], index: 0, kind: input, shape index: {}]   ;;  %s1899_s1 = inlined_call_operand.vmem [shape: bf16[9,16,3], index: 1, kind: input, shape index: {}]   ;;  %s1900_s2 = inlined_call_operand.vmem [shape: f32[16,1], index: 2, kind: input, shape index: {}]   ;;  %s1901_s3 = inlined_call_operand.vmem [shape: f32[2,16,288], index: 3, kind: output, shape index: {}]  }
   0x1 LB: > { %s1462_s13 = sadd.s32 4294967295, %s1672_s12   ;;  %p1466_p0 = scmp.ge.s32.totalorder %s1672_s12, 1  ;;  %s1672_s12 = sphi %s1707_s12, %s13_s12  }
   0x2   : > { %p137_p1 = scmp.lt.s32.totalorder %s1672_s12, 3 }
   0x4   : > { %p138_p2 = pnand %p1466_p0, %p137_p1 }
   0x5   : > { %p161_p3 = scmp.lt.s32.totalorder (!%p138_p2), %s1462_s13, 1  ;;  %v190_v0 = vlaneseq (!%p138_p2)  ;;  %v1674_v1 = vmov (!%p138_p2), 1983009808   ;;  %v1675_v5 = vmov (!%p138_p2), 0.0   ;;  %vm1676_vm0 = vmmov (!%p138_p2), 0   ;;  %s1677_s18 = smov (!%p138_p2), 127  }
   0x6   : > { %141 = sbr.rel (%p138_p2) target bundleno = 464 (0x1d0), region = 32  ;;  %v188_v2 = vunpack.c.l.s4 (!%p138_p2), %v1674_v1  ;;  %1538 = vmatprep.subr.bf16.mxu1 (!%p138_p2), %v1675_v5  ;;  %1540 = vmatprep.mubr.msk.bf16.mxu1 (!%p138_p2), %vm1676_vm0, %v1675_v5  ;;  %s1678_s19 = smov (!%p138_p2), 126   ;;  %v1679_v21 = vmov (!%p138_p2), 0   ;;  %v172_v48 = vld [vmem:[%s1900_s2] sm:$0xff] (!%p138_p2)  ;;  %v173_v49 = vld [vmem:[%s1900_s2 + $0x8] sm:$0xff] (!%p138_p2)  ;;  %vm215_vm1 = vcmask (!%p138_p2), 1040384  }
   0x7   : > { %v191_v3 = vshrl.u32 (!%p138_p2), %v190_v0, 7  ;;  %260 = vmatprep.mubr.bf16.mxu0 (!%p138_p2), %v1679_v21  ;;  %1647 = vset.pattern.permute.xlu0 (!%p138_p2), %v1679_v21  ;;  %s1680_s20 = smov (!%p138_p2), 110   ;;  %s1681_s21 = smov (!%p138_p2), 109   ;;  %vm216_vm2 = vcmask (!%p138_p2), 1041408   ;;  %v1686_v51 = vmov (!%p138_p2), 65535   ;;  %vm208_vm3 = vcmask (!%p138_p2), 1039360  }
   0x8   : > { %v189_v4 = vunpack.c.0.s8 (!%p138_p2), %v188_v2  ;;  %1648 = vset.pattern.permute.xlu1 (!%p138_p2), %v1679_v21  ;;  %s1682_s22 = smov (!%p138_p2), 108   ;;  %s1683_s23 = smov (!%p138_p2), 92   ;;  %v217_v52 = vsel (!%p138_p2), %vm215_vm1, 4294967295, %v1686_v51  ;;  %v1657_v61 = vld [vmem:[%s1899_s1 + $0x8] sm:$0xff] (!%p138_p2)   ;;  %vm445_vm4 = vcmask (!%p138_p2), 1031168   ;;  %vm211_vm5 = vcmask (!%p138_p2), 23552  }
   0x9   : > { %s1684_s24 = smov (!%p138_p2), 91   ;;  %s1685_s25 = smov (!%p138_p2), 90   ;;  %v1772_v54 = vsel (!%p138_p2), %vm216_vm2, %v217_v52, 0  ;;  %vm582_vm6 = vcmask (!%p138_p2), 900096   ;;  %vm719_vm7 = vcmask (!%p138_p2), 891904   ;;  %vm856_vm8 = vcmask (!%p138_p2), 883712  }
   0xa   : > { %v1719_v6 = vsub.s32 (!%p138_p2), %v189_v4, %v191_v3  ;;  %vm993_vm9 = vcmask (!%p138_p2), 752640   ;;  %v1664_v52 = vld [vmem:[%s1899_s1 + $0x38] sm:$0xff] (!%p138_p2)   ;;  %vm1130_vm10 = vcmask (!%p138_p2), 744448   ;;  %vm1267_vm11 = vcmask (!%p138_p2), 736256  }
   0xb   : > { %vm1402_vm12 = vcmask (!%p138_p2), 261120  }
   0xd   : > { %s1903_s13 = smov (!%p161_p3, %s1462_s13), 1 }
   0xe   : > { %s1624_s14 = smul.u32 6, %s1903_s13 }
  0x10   : > { %s1724_s17 = scalar_lea.vmem %s1898_s0, %s1624_s14 }
  0x11   : > { %v174_v7 = vld [vmem:[%s1724_s17] sm:$0x3f] }
  0x12   : > { %v413_v8 = vld [vmem:[%s1724_s17] sm:$0x3f]  ;;  %v1731_v9 = vrot.slane %v174_v7, %v1719_v6  ;;  %v186_v10 = vcombine.high %v174_v7, %v174_v7 }
  0x13   : > { %v430_v11 = vrot.slane %v413_v8, %v1719_v6  ;;  %v550_v14 = vld [vmem:[%s1724_s17] sm:$0x3f]  ;;  %v423_v16 = vcombine.high %v413_v8, %v413_v8 }
  0x14   : > { %202 = vrot.lane.b32.xlu1 %v1731_v9, %s1677_s18  ;;  %v1737_v12 = vcombine.high %v1731_v9, %v1731_v9  ;;  %v1742_v15 = vrot.slane %v186_v10, %v1719_v6  ;;  %v560_v17 = vcombine.high %v550_v14, %v550_v14  ;;  %v687_v18 = vld [vmem:[%s1724_s17] sm:$0x3f]  ;;  %v567_v20 = vrot.slane %v550_v14, %v1719_v6  ;;  %v1659_v14 = vld [vmem:[%s1899_s1 + $0x10] sm:$0xff]  }
  0x15   : > { %v438_v13 = vcombine.high %v430_v11, %v430_v11  ;;  %v437_v19 = vrot.slane %v423_v16, %v1719_v6  ;;  %v704_v23 = vrot.slane %v687_v18, %v1719_v6  ;;  %v824_v26 = vld [vmem:[%s1724_s17] sm:$0x3f]  ;;  %v697_v27 = vcombine.high %v687_v18, %v687_v18 }
  0x16   : > { %204 = vrot.lane.b32.xlu0 %v1737_v12, %s1677_s18  ;;  %v574_v22 = vrot.slane %v560_v17, %v1719_v6  ;;  %v575_v24 = vcombine.high %v567_v20, %v567_v20  ;;  %v834_v28 = vcombine.high %v824_v26, %v824_v26  ;;  %v961_v29 = vld [vmem:[%s1724_s17] sm:$0x3f]  ;;  %v841_v31 = vrot.slane %v824_v26, %v1719_v6 }
  0x17   : > { %v712_v25 = vcombine.high %v704_v23, %v704_v23  ;;  %v711_v30 = vrot.slane %v697_v27, %v1719_v6  ;;  %v978_v33 = vrot.slane %v961_v29, %v1719_v6  ;;  %v1098_v36 = vld [vmem:[%s1724_s17] sm:$0x3f]  ;;  %v971_v37 = vcombine.high %v961_v29, %v961_v29 }
  0x18   : > { %441 = vrot.lane.b32.xlu1 %v438_v13, %s1678_s19  ;;  %v848_v32 = vrot.slane %v834_v28, %v1719_v6  ;;  %v849_v34 = vcombine.high %v841_v31, %v841_v31  ;;  %v1108_v38 = vcombine.high %v1098_v36, %v1098_v36  ;;  %v1115_v40 = vrot.slane %v1098_v36, %v1719_v6  ;;  %v1235_v41 = vld [vmem:[%s1724_s17] sm:$0x3f] }
  0x19   : > { %v986_v35 = vcombine.high %v978_v33, %v978_v33  ;;  %v985_v39 = vrot.slane %v971_v37, %v1719_v6  ;;  %v1252_v43 = vrot.slane %v1235_v41, %v1719_v6  ;;  %v1245_v46 = vcombine.high %v1235_v41, %v1235_v41  ;;  %v1658_v7 = vld [vmem:[%s1899_s1] sm:$0xff]  }
  0x1a   : > { %206 = vrot.lane.b32.xlu0 %v1742_v15, %s1677_s18  ;;  %v1122_v42 = vrot.slane %v1108_v38, %v1719_v6  ;;  %v1123_v44 = vcombine.high %v1115_v40, %v1115_v40  ;;  %v324_v59 = vand.u32 %v1772_v54, %v1737_v12  ;;  %v327_v63 = vand.u32 %v1772_v54, %v1742_v15 }
  0x1b   : > { %v1260_v45 = vcombine.high %v1252_v43, %v1252_v43  ;;  %v1259_v47 = vrot.slane %v1245_v46, %v1719_v6  ;;  %v321_v2 = vand.u32 %v1772_v54, %v1731_v9 }
  0x1c   : > { %439 = vrot.lane.b32.xlu1 %v430_v11, %s1678_s19 }
  0x1e   : > { %443 = vrot.lane.b32.xlu0 %v437_v19, %s1678_s19 }
  0x20   : > { %580 = vrot.lane.b32.xlu1 %v574_v22, %s1680_s20  ;;  %v1660_v22 = vld [vmem:[%s1899_s1 + $0x18] sm:$0xff]  }
  0x22   : > { %578 = vrot.lane.b32.xlu0 %v575_v24, %s1680_s20 }
  0x24   : > { %715 = vrot.lane.b32.xlu1 %v712_v25, %s1681_s21 }
  0x26   : > { %576 = vrot.lane.b32.xlu0 %v567_v20, %s1680_s20 }
  0x28   : > { %713 = vrot.lane.b32.xlu1 %v704_v23, %s1681_s21 }
  0x2a   : > { %717 = vrot.lane.b32.xlu0 %v711_v30, %s1681_s21  ;;  %v1661_v30 = vld [vmem:[%s1899_s1 + $0x20] sm:$0xff]  }
  0x2c   : > { %854 = vrot.lane.b32.xlu1 %v848_v32, %s1682_s22 }
  0x2e   : > { %852 = vrot.lane.b32.xlu0 %v849_v34, %s1682_s22 }
  0x30   : > { %989 = vrot.lane.b32.xlu1 %v986_v35, %s1683_s23 }
  0x32   : > { %850 = vrot.lane.b32.xlu0 %v841_v31, %s1682_s22 }
  0x34   : > { %987 = vrot.lane.b32.xlu1 %v978_v33, %s1683_s23 }
  0x36   : > { %991 = vrot.lane.b32.xlu0 %v985_v39, %s1683_s23  ;;  %v1662_v39 = vld [vmem:[%s1899_s1 + $0x28] sm:$0xff]   ;;  %s1625_s23 = smul.u32 48, %s1903_s13 }
  0x38   : > { %1128 = vrot.lane.b32.xlu1 %v1122_v42, %s1684_s24  ;;  %s170_s26 = scalar_lea.vmem %s1901_s3, %s1625_s23 }
  0x3a   : > { %1126 = vrot.lane.b32.xlu0 %v1123_v44, %s1684_s24 }
  0x3c   : > { %1263 = vrot.lane.b32.xlu1 %v1260_v45, %s1685_s25  ;;  %v1663_v45 = vld [vmem:[%s1899_s1 + $0x30] sm:$0xff]  }
  0x3e   : > { %1124 = vrot.lane.b32.xlu0 %v1115_v40, %s1684_s24 }
  0x40   : > { %1261 = vrot.lane.b32.xlu1 %v1252_v43, %s1685_s25 }
  0x42   : > { %1265 = vrot.lane.b32.xlu0 %v1259_v47, %s1685_s25 }
  0x44   : > { %1379 = vperm.xlu1 %1648, %v173_v49  }
  0x46   : > { %1374 = vperm.xlu0 %1647, %v172_v48  }
  0x86   : > { %v203_v53 = vpop.permute.xlu1 %202 }
  0x88   : > { %v205_v50 = vpop.permute.xlu0 %204 }
  0x89   : > { %v209_v55 = vsel %vm208_vm3, %v203_v53, %v205_v50 }
  0x8a   : > { %v442_v62 = vpop.permute.xlu1 %441  ;;  %v220_v0 = vand.u32 %v1772_v54, %v209_v55 }
  0x8c   : > { %v207_v56 = vpop.permute.xlu0 %206 }
  0x8d   : > { %v226_v57 = vand.u32 %v1772_v54, %v207_v56  ;;  %v210_v58 = vsel %vm208_vm3, %v205_v50, %v207_v56 }
  0x8e   : > { %v223_v60 = vand.u32 %v1772_v54, %v210_v58  ;;  %v440_v6 = vpop.permute.xlu1 %439 }
  0x8f   : > { %1539 = vmatpush3.bf16.msra.mxu1 %v226_v57  ;;  %v446_v10 = vsel %vm445_vm4, %v440_v6, %v442_v62 }
  0x90   : > { %228 = vmatprep.subr.bf16.mxu0 %v223_v60  ;;  %1544 = vmatprep.subr.bf16.mxu1 %v1675_v5  ;;  %v444_v1 = vpop.permute.xlu0 %443  ;;  %v452_v13 = vand.u32 %v446_v10, %v1772_v54 }
  0x91   : > { %229 = vmatpush1.bf16.msra.mxu0 %v220_v0  ;;  %v447_v3 = vsel %vm445_vm4, %v442_v62, %v444_v1  ;;  %v458_v8 = vand.u32 %v444_v1, %v1772_v54 }
  0x92   : > { %1541 = vmatmul.mubr.msk.bf16.vlgmr.msra.gmra.mrb[0].mxu1 %vm211_vm5, %v1657_v61  ;;  %329 = vmatprep.subr.bf16.mxu0 %v324_v59  ;;  %v455_v4 = vand.u32 %v447_v3, %v1772_v54  ;;  %v581_v11 = vpop.permute.xlu1 %580  ;;  %v1665_v59 = vld [vmem:[%s1899_s1 + $0x40] sm:$0xff]  }
  0x93   : > { %1545 = vmatpush3.bf16.msra.mxu1 %v327_v63  ;;  %1546 = vmatprep.mubr.msk.bf16.mxu1 %vm1676_vm0, %v1675_v5  ;;  %v595_v17 = vand.u32 %v581_v11, %v1772_v54 }
  0x94   : > { %1472 = vmatmul.mubr.msk.bf16.vlgmr.msra.gmra.mrb[0].mxu0 %vm211_vm5, %v1657_v61  ;;  %1550 = vmatprep.subr.bf16.mxu1 %v1675_v5  ;;  %v579_v9 = vpop.permute.xlu0 %578 }
  0x95   : > { %330 = vmatpush1.bf16.msra.mxu0 %v321_v2  ;;  %361 = vmatprep.mubr.bf16.mxu0 %v1679_v21  ;;  %v584_v12 = vsel %vm582_vm6, %v579_v9, %v581_v11 }
  0x96   : > { %460 = vmatprep.subr.bf16.mxu0 %v455_v4  ;;  %v592_v15 = vand.u32 %v584_v12, %v1772_v54  ;;  %v716_v18 = vpop.permute.xlu1 %715 }
  0x98   : > { %v577_v16 = vpop.permute.xlu0 %576 }
  0x99   : > { %v583_v20 = vsel %vm582_vm6, %v577_v16, %v579_v9 }
  0x9a   : > { %1547 = vmatmul.mubr.msk.bf16.vlgmr.msra.gmra.mrb[4].mxu1 %vm211_vm5, %v1658_v7  ;;  %v714_v23 = vpop.permute.xlu1 %713  ;;  %v589_v27 = vand.u32 %v583_v20, %v1772_v54 }
  0x9b   : > { %1551 = vmatpush3.bf16.msra.mxu1 %v458_v8  ;;  %1552 = vmatprep.mubr.msk.bf16.mxu1 %vm1676_vm0, %v1675_v5  ;;  %v720_v34 = vsel %vm719_vm7, %v714_v23, %v716_v18 }
  0x9c   : > { %1556 = vmatprep.subr.bf16.mxu1 %v1675_v5  ;;  %v718_v19 = vpop.permute.xlu0 %717  ;;  %v726_v37 = vand.u32 %v720_v34, %v1772_v54 }
  0x9d   : > { %v721_v24 = vsel %vm719_vm7, %v716_v18, %v718_v19  ;;  %v732_v25 = vand.u32 %v718_v19, %v1772_v54 }
  0x9e   : > { %v729_v28 = vand.u32 %v721_v24, %v1772_v54  ;;  %v855_v29 = vpop.permute.xlu1 %854 }
  0x9f   : > { %v869_v32 = vand.u32 %v855_v29, %v1772_v54 }
  0xa0   : > { %1475 = vmatmul.mubr.msk.bf16.vlgmr.msra.gmra.mrb[0].mxu0 %vm211_vm5, %v1658_v7  ;;  %v853_v26 = vpop.permute.xlu0 %852 }
  0xa1   : > { %461 = vmatpush1.bf16.msra.mxu0 %v452_v13  ;;  %492 = vmatprep.mubr.bf16.mxu0 %v1679_v21  ;;  %v858_v35 = vsel %vm856_vm8, %v853_v26, %v855_v29 }
  0xa2   : > { %1553 = vmatmul.mubr.msk.bf16.vlgmr.msra.gmra.mrb[8].mxu1 %vm211_vm5, %v1659_v14  ;;  %597 = vmatprep.subr.bf16.mxu0 %v592_v15  ;;  %v990_v33 = vpop.permute.xlu1 %989  ;;  %v866_v38 = vand.u32 %v858_v35, %v1772_v54 }
  0xa3   : > { %1557 = vmatpush3.bf16.msra.mxu1 %v595_v17  ;;  %1558 = vmatprep.mubr.msk.bf16.mxu1 %vm1676_vm0, %v1675_v5 }
  0xa4   : > { %1562 = vmatprep.subr.bf16.mxu1 %v1675_v5  ;;  %v851_v31 = vpop.permute.xlu0 %850 }
  0xa5   : > { %v857_v44 = vsel %vm856_vm8, %v851_v31, %v853_v26 }
  0xa6   : > { %v988_v40 = vpop.permute.xlu1 %987  ;;  %v863_v49 = vand.u32 %v857_v44, %v1772_v54 }
  0xa7   : > { %v994_v55 = vsel %vm993_vm9, %v988_v40, %v990_v33 }
  0xa8   : > { %v992_v36 = vpop.permute.xlu0 %991  ;;  %v1000_v57 = vand.u32 %v994_v55, %v1772_v54 }
  0xa9   : > { %v1006_v41 = vand.u32 %v992_v36, %v1772_v54  ;;  %v995_v47 = vsel %vm993_vm9, %v990_v33, %v992_v36 }
  0xaa   : > { %1559 = vmatmul.mubr.msk.bf16.vlgmr.msra.gmra.mrb[12].mxu1 %vm211_vm5, %v1660_v22  ;;  %v1129_v43 = vpop.permute.xlu1 %1128  ;;  %v1003_v50 = vand.u32 %v995_v47, %v1772_v54 }
  0xab   : > { %1563 = vmatpush3.bf16.msra.mxu1 %v732_v25  ;;  %1564 = vmatprep.mubr.msk.bf16.mxu1 %vm1676_vm0, %v1675_v5  ;;  %v1143_v48 = vand.u32 %v1129_v43, %v1772_v54 }
  0xac   : > { %1480 = vmatmul.mubr.msk.bf16.vlgmr.msra.gmra.mrb[0].mxu0 %vm211_vm5, %v1659_v14  ;;  %1568 = vmatprep.subr.bf16.mxu1 %v1675_v5  ;;  %v1127_v42 = vpop.permute.xlu0 %1126 }
  0xad   : > { %598 = vmatpush1.bf16.msra.mxu0 %v589_v27  ;;  %629 = vmatprep.mubr.bf16.mxu0 %v1679_v21  ;;  %v1132_v56 = vsel %vm1130_vm10, %v1127_v42, %v1129_v43 }
  0xae   : > { %734 = vmatprep.subr.bf16.mxu0 %v729_v28  ;;  %v1140_v58 = vand.u32 %v1132_v56, %v1772_v54  ;;  %v1264_v61 = vpop.permute.xlu1 %1263 }
  0xb0   : > { %v1125_v46 = vpop.permute.xlu0 %1124 }
  0xb1   : > { %v1131_v60 = vsel %vm1130_vm10, %v1125_v46, %v1127_v42 }
  0xb2   : > { %1565 = vmatmul.mubr.msk.bf16.vlgmr.msra.gmra.mrb[16].mxu1 %vm211_vm5, %v1661_v30  ;;  %v1137_v62 = vand.u32 %v1131_v60, %v1772_v54  ;;  %v1262_v0 = vpop.permute.xlu1 %1261 }
  0xb3   : > { %1569 = vmatpush3.bf16.msra.mxu1 %v869_v32  ;;  %1570 = vmatprep.mubr.msk.bf16.mxu1 %vm1676_vm0, %v1675_v5  ;;  %v1268_v1 = vsel %vm1267_vm11, %v1262_v0, %v1264_v61 }
  0xb4   : > { %1574 = vmatprep.subr.bf16.mxu1 %v1675_v5  ;;  %v1266_v51 = vpop.permute.xlu0 %1265  ;;  %v1274_v2 = vand.u32 %v1268_v1, %v1772_v54 }
  0xb5   : > { %v1280_v53 = vand.u32 %v1266_v51, %v1772_v54 }
  0xb8   : > { %1485 = vmatmul.mubr.msk.bf16.vlgmr.msra.gmra.mrb[0].mxu0 %vm211_vm5, %v1660_v22 }
  0xb9   : > { %735 = vmatpush1.bf16.msra.mxu0 %v726_v37  ;;  %766 = vmatprep.mubr.bf16.mxu0 %v1679_v21 }
  0xba   : > { %1571 = vmatmul.mubr.msk.bf16.vlgmr.msra.gmra.mrb[20].mxu1 %vm211_vm5, %v1662_v39  ;;  %871 = vmatprep.subr.bf16.mxu0 %v866_v38 }
  0xbb   : > { %1575 = vmatpush3.bf16.msra.mxu1 %v1006_v41  ;;  %1576 = vmatprep.mubr.msk.bf16.mxu1 %vm1676_vm0, %v1675_v5 }
  0xbc   : > { %1580 = vmatprep.subr.bf16.mxu1 %v1675_v5 }
  0xc2   : > { %1577 = vmatmul.mubr.msk.bf16.vlgmr.msra.gmra.mrb[24].mxu1 %vm211_vm5, %v1663_v45 }
  0xc3   : > { %1581 = vmatpush3.bf16.msra.mxu1 %v1143_v48  ;;  %1582 = vmatprep.mubr.msk.bf16.mxu1 %vm1676_vm0, %v1675_v5  ;;  %v1380_v55 = vpop.permute.xlu1 %1379 }
  0xc4   : > { %1490 = vmatmul.mubr.msk.bf16.vlgmr.msra.gmra.mrb[0].mxu0 %vm211_vm5, %v1661_v30  ;;  %1586 = vmatprep.subr.bf16.mxu1 %v1675_v5 }
  0xc5   : > { %872 = vmatpush1.bf16.msra.mxu0 %v863_v49  ;;  %903 = vmatprep.mubr.bf16.mxu0 %v1679_v21 }
  0xc6   : > { %1008 = vmatprep.subr.bf16.mxu0 %v1003_v50  ;;  %v1375_v50 = vpop.permute.xlu0 %1374 }
  0xca   : > { %1583 = vmatmul.mubr.msk.bf16.vlgmr.msra.gmra.mrb[28].mxu1 %vm211_vm5, %v1664_v52 }
  0xcb   : > { %1587 = vmatpush3.bf16.msra.mxu1 %v1280_v53  ;;  %1588 = vmatprep.mubr.msk.bf16.mxu1 %vm1676_vm0, %v1675_v5  ;;  %v1269_v5 = vsel %vm1267_vm11, %v1264_v61, %v1266_v51 }
  0xcc   : > { %v1277_v63 = vand.u32 %v1269_v5, %v1772_v54 }
  0xd0   : > { %1495 = vmatmul.mubr.msk.bf16.vlgmr.msra.gmra.mrb[0].mxu0 %vm211_vm5, %v1662_v39 }
  0xd1   : > { %1009 = vmatpush1.bf16.msra.mxu0 %v1000_v57  ;;  %1040 = vmatprep.mubr.bf16.mxu0 %v1679_v21 }
  0xd2   : > { %1589 = vmatmul.mubr.msk.bf16.vlgmr.msra.gmra.mrb[32].mxu1 %vm211_vm5, %v1665_v59  ;;  %1145 = vmatprep.subr.bf16.mxu0 %v1140_v58 }
  0xdc   : > { %1500 = vmatmul.mubr.msk.bf16.vlgmr.msra.gmra.mrb[0].mxu0 %vm211_vm5, %v1663_v45 }
  0xdd   : > { %1146 = vmatpush1.bf16.msra.mxu0 %v1137_v62  ;;  %1177 = vmatprep.mubr.bf16.mxu0 %v1679_v21 }
  0xde   : > { %1282 = vmatprep.subr.bf16.mxu0 %v1277_v63 }
  0xe8   : > { %1505 = vmatmul.mubr.msk.bf16.vlgmr.msra.gmra.mrb[0].mxu0 %vm211_vm5, %v1664_v52 }
  0xe9   : > { %1283 = vmatpush1.bf16.msra.mxu0 %v1274_v2  ;;  %1314 = vmatprep.mubr.bf16.mxu0 %v1679_v21 }
  0xf4   : > { %1510 = vmatmul.mubr.msk.bf16.vlgmr.msra.gmra.mrb[0].mxu0 %vm211_vm5, %v1665_v59 }
 0x165   : > { %v305_v3 = vpop.f32.mrb[0].mxu1 }
 0x166   : > { %v1542_v4 = vpop.f32.mrb[1].mxu1 }
 0x167   : > { %v308_v6 = vpop.f32.mrb[2].mxu1 }
 0x168   : > { %v1543_v7 = vpop.f32.mrb[3].mxu1 }
 0x16d   : > { %v406_v8 = vpop.f32.mrb[4].mxu1 }
 0x16e   : > { %v407_v9 = vadd.f32 %v406_v8, %v305_v3  ;;  %v1548_v10 = vpop.f32.mrb[5].mxu1 }
 0x16f   : > { %v409_v11 = vpop.f32.mrb[6].mxu1 }
 0x170   : > { %v410_v12 = vadd.f32 %v409_v11, %v308_v6  ;;  %v1549_v13 = vpop.f32.mrb[7].mxu1 }
 0x175   : > { %v537_v14 = vpop.f32.mrb[8].mxu1 }
 0x176   : > { %v546_v15 = vadd.f32 %v537_v14, %v407_v9  ;;  %v1554_v54 = vpop.f32.mrb[9].mxu1 }
 0x177   : > { %v540_v16 = vpop.f32.mrb[10].mxu1 }
 0x178   : > { %v549_v17 = vadd.f32 %v540_v16, %v410_v12  ;;  %v1555_v18 = vpop.f32.mrb[11].mxu1 }
 0x17d   : > { %v674_v19 = vpop.f32.mrb[12].mxu1 }
 0x17e   : > { %v683_v21 = vadd.f32 %v674_v19, %v546_v15  ;;  %v1560_v20 = vpop.f32.mrb[13].mxu1 }
 0x17f   : > { %v677_v22 = vpop.f32.mrb[14].mxu1 }
 0x180   : > { %v686_v23 = vadd.f32 %v677_v22, %v549_v17  ;;  %v1561_v24 = vpop.f32.mrb[15].mxu1 }
 0x185   : > { %v811_v25 = vpop.f32.mrb[16].mxu1 }
 0x186   : > { %v820_v26 = vadd.f32 %v811_v25, %v683_v21  ;;  %v1566_v27 = vpop.f32.mrb[17].mxu1 }
 0x187   : > { %v814_v28 = vpop.f32.mrb[18].mxu1 }
 0x188   : > { %v823_v29 = vadd.f32 %v814_v28, %v686_v23  ;;  %v1567_v30 = vpop.f32.mrb[19].mxu1 }
 0x18d   : > { %v948_v31 = vpop.f32.mrb[20].mxu1 }
 0x18e   : > { %v957_v32 = vadd.f32 %v948_v31, %v820_v26  ;;  %v1572_v33 = vpop.f32.mrb[21].mxu1 }
 0x18f   : > { %v951_v34 = vpop.f32.mrb[22].mxu1 }
 0x190   : > { %v960_v35 = vadd.f32 %v951_v34, %v823_v29  ;;  %v1573_v36 = vpop.f32.mrb[23].mxu1 }
 0x195   : > { %v1085_v37 = vpop.f32.mrb[24].mxu1 }
 0x196   : > { %v1094_v38 = vadd.f32 %v1085_v37, %v957_v32  ;;  %v1578_v39 = vpop.f32.mrb[25].mxu1 }
 0x197   : > { %v1088_v40 = vpop.f32.mrb[26].mxu1 }
 0x198   : > { %v1097_v41 = vadd.f32 %v1088_v40, %v960_v35  ;;  %v1579_v42 = vpop.f32.mrb[27].mxu1 }
 0x19d   : > { %v1222_v43 = vpop.f32.mrb[28].mxu1 }
 0x19e   : > { %v1231_v44 = vadd.f32 %v1222_v43, %v1094_v38  ;;  %v1584_v45 = vpop.f32.mrb[29].mxu1 }
 0x19f   : > { %v1225_v46 = vpop.f32.mrb[30].mxu1 }
 0x1a0   : > { %v1234_v47 = vadd.f32 %v1225_v46, %v1097_v41  ;;  %v1585_v48 = vpop.f32.mrb[31].mxu1 }
 0x1a5   : > { %v1359_v49 = vpop.f32.mrb[32].mxu1 }
 0x1a6   : > { %v1368_v51 = vadd.f32 %v1359_v49, %v1231_v44  ;;  %v1590_v52 = vpop.f32.mrb[33].mxu1 }
 0x1a7   : > { %v1362_v53 = vpop.f32.mrb[34].mxu1 }
 0x1a8   : > { %v1384_v56 = vadd.f32 %v1375_v50, %v1368_v51  ;;  %v1371_v57 = vadd.f32 %v1362_v53, %v1234_v47  ;;  %v1591_v58 = vpop.f32.mrb[35].mxu1 }
 0x1aa   : > { %v1514_v59 = vclamps-f32 %v1384_v56, 1.0  ;;  %v1387_v60 = vadd.f32 %v1380_v55, %v1371_v57 }
 0x1ac   : > { %1403 = vst.msk [vmem:[%s170_s26 + $0x10] sm:$0xff] %vm1402_vm12, %v1514_v59  ;;  %v1517_v61 = vclamps-f32 %v1387_v60, 1.0 }
 0x1ae   : > { %1406 = vst.msk [vmem:[%s170_s26 + $0x28] sm:$0xff] %vm1402_vm12, %v1517_v61 }
 0x1c7   : > { %v1316_v5 = vpop.f32.mrb[0].mxu0 }
 0x1c8   : > { %v1382_v62 = vadd.f32 %v1375_v50, %v1316_v5  ;;  %v1318_v63 = vpop.f32.mrb[1].mxu0 }
 0x1c9   : > { %v1383_v0 = vadd.f32 %v1375_v50, %v1318_v63  ;;  %v1320_v1 = vpop.f32.mrb[2].mxu0 }
 0x1ca   : > { %v1512_v2 = vclamps-f32 %v1382_v62, 1.0  ;;  %v1385_v3 = vadd.f32 %v1380_v55, %v1320_v1  ;;  %v1322_v4 = vpop.f32.mrb[3].mxu0 }
 0x1cb   : > { %v1513_v6 = vclamps-f32 %v1383_v0, 1.0  ;;  %v1386_v7 = vadd.f32 %v1380_v55, %v1322_v4 }
 0x1cc   : > { %1400 = vst [vmem:[%s170_s26] sm:$0xff] %v1512_v2  ;;  %v1515_v8 = vclamps-f32 %v1385_v3, 1.0 }
 0x1cd   : > { %1401 = vst [vmem:[%s170_s26 + $0x8] sm:$0xff] %v1513_v6  ;;  %v1516_v9 = vclamps-f32 %v1386_v7, 1.0 }
 0x1ce   : > { %1404 = vst [vmem:[%s170_s26 + $0x18] sm:$0xff] %v1515_v8 }
 0x1cf   : > { %1405 = vst [vmem:[%s170_s26 + $0x20] sm:$0xff] %v1516_v9 }
 0x1d0 PF: > { %s13_s12 = sadd.s32 1, %s1672_s12  }
 0x1d1   : > { %p10_p4 = scmp.ge.s32.totalorder %s13_s12, 4  }
 0x1d3   :  { %12 = sbr.rel (!%p10_p4) target bundleno = 1 (0x1), region = 70 }

</bundles_post_ra>
